<compile_context>
chip_gen: v7x
topology: tpu7x:2x2x1
jax: 0.10.0
libtpu: 0.0.40
codegen_flags: <defaults>
</compile_context>

<pallas_src>
import functools

import jax
import jax.numpy as jnp
import numpy as np
from jax.experimental import pallas as pl
from jax.experimental.pallas import tpu as pltpu


# ------------------------------ fused kernel ---------------------------------

def _mha_fused_kernel(q_ref, k_ref, v_ref,
                      wq_ref, wk_ref, wv_ref,
                      wp_ref, bp_ref, g_ref, beta_ref,
                      out_ref, *attn_refs,
                      eps, inv_scale):
    f32 = jnp.float32
    bf16 = jnp.bfloat16
    n_heads = wq_ref.shape[0]

    q = q_ref[0]                                   # (Lq, D) f32 -- residual too
    k = k_ref[0]                                   # (Lk, D)
    v = v_ref[0]                                   # (Lk, D)

    # Head-batched projections; operands bf16 (MXU-native), accumulate in f32.
    qb = jnp.broadcast_to(q.astype(bf16), (n_heads,) + q.shape)   # (H, Lq, D)
    kb = jnp.broadcast_to(k.astype(bf16), (n_heads,) + k.shape)   # (H, Lk, D)
    vb = jnp.broadcast_to(v.astype(bf16), (n_heads,) + v.shape)   # (H, Lk, D)

    q_heads = jnp.einsum("hld,hdk->hlk", qb, wq_ref[...],
                         preferred_element_type=f32)              # (H, Lq, dk)
    k_heads = jnp.einsum("hld,hdk->hlk", kb, wk_ref[...],
                         preferred_element_type=f32)              # (H, Lk, dk)
    v_heads = jnp.einsum("hld,hdv->hlv", vb, wv_ref[...],
                         preferred_element_type=f32)              # (H, Lk, dv)

    # Fold 1/sqrt(d_k) into q (H*Lq*dk muls, not H*Lq*Lk), fused with the cast.
    q_s = (q_heads * inv_scale).astype(bf16)
    k_s = k_heads.astype(bf16)
    v_s = v_heads.astype(bf16)

    # Scores + numerically-stable softmax (all heads batched).
    scores = jnp.einsum("hqd,hkd->hqk", q_s, k_s,
                        preferred_element_type=f32)               # (H, Lq, Lk)
    m = jnp.max(scores, axis=-1, keepdims=True)
    e = jnp.exp(scores - m)
    p = e * pl.reciprocal(jnp.sum(e, axis=-1, keepdims=True), approx=True)

    if attn_refs:                                   # one store for ALL heads
        attn_refs[0][:, 0] = p.astype(attn_refs[0].dtype)

    ctx = jnp.einsum("hqk,hkv->hqv", p.astype(bf16), v_s,
                     preferred_element_type=f32)                  # (H, Lq, dv)

    # Output projection without the lane-axis concat:
    #   concat_h(ctx_h) @ Wp  ==  sum_h ctx_h @ Wp_h
    y = jnp.sum(jnp.einsum("hqv,hvd->hqd", ctx.astype(bf16), wp_ref[...],
                           preferred_element_type=f32), axis=0)   # (Lq, D)
    z = q + y + bp_ref[...]

    # Module's LayerNormalization: torch.std is Bessel-corrected (divide by
    # d_model-1) and eps is added to the *std*, not the variance.
    mean = jnp.mean(z, axis=-1, keepdims=True)
    diff = z - mean
    std = jnp.sqrt(jnp.sum(diff * diff, axis=-1, keepdims=True)
                   * (1.0 / (z.shape[-1] - 1)))
    inv = pl.reciprocal(std + eps, approx=True)
    out_ref[0] = g_ref[...] * (diff * inv) + beta_ref[...]


# --------------------------------- wrapper ------------------------------------

def multi_head_attention(q, k, v, params, d_k, attn_mask=None,
                         return_attn=False, eps=1e-3,
                         attn_dtype=jnp.bfloat16):
    # TODO(synk): boolean attn_mask path not implemented (eval path uses None).
    assert attn_mask is None

    w_q, w_k, w_v = params["w_q"], params["w_k"], params["w_v"]
    H, D, dk = w_q.shape
    dv = w_v.shape[2]
    B, Lq, _ = q.shape
    Lk = k.shape[1]

    bf16 = jnp.bfloat16
    wq3 = w_q.astype(bf16)                                    # (H, D, dk)
    wk3 = w_k.astype(bf16)                                    # (H, D, dk)
    wv3 = w_v.astype(bf16)                                    # (H, D, dv)
    wp3 = params["proj_w_t"].reshape(H, dv, D).astype(bf16)   # (H, dv, D)

    kernel = functools.partial(_mha_fused_kernel, eps=eps,
                               inv_scale=float(1.0 / np.sqrt(d_k)))

    out_shape = [jax.ShapeDtypeStruct((B, Lq, D), jnp.float32)]
    out_specs = [pl.BlockSpec((1, Lq, D), lambda b: (b, 0, 0))]
    if return_attn:
        out_shape.append(jax.ShapeDtypeStruct((H, B, Lq, Lk), attn_dtype))
        out_specs.append(pl.BlockSpec((H, 1, Lq, Lk), lambda b: (0, b, 0, 0)))

    grid_spec = pltpu.PrefetchScalarGridSpec(
        num_scalar_prefetch=0,
        grid=(B,),
        in_specs=[
            pl.BlockSpec((1, Lq, D), lambda b: (b, 0, 0)),    # q (residual too)
            pl.BlockSpec((1, Lk, D), lambda b: (b, 0, 0)),    # k
            pl.BlockSpec((1, Lk, D), lambda b: (b, 0, 0)),    # v
            pl.BlockSpec((H, D, dk), lambda b: (0, 0, 0)),    # Wq (resident)
            pl.BlockSpec((H, D, dk), lambda b: (0, 0, 0)),    # Wk (resident)
            pl.BlockSpec((H, D, dv), lambda b: (0, 0, 0)),    # Wv (resident)
            pl.BlockSpec((H, dv, D), lambda b: (0, 0, 0)),    # Wp per-head
            pl.BlockSpec((1, D), lambda b: (0, 0)),           # proj bias
            pl.BlockSpec((1, D), lambda b: (0, 0)),           # gamma
            pl.BlockSpec((1, D), lambda b: (0, 0)),           # beta
        ],
        out_specs=out_specs,
    )

    result = pl.pallas_call(
        kernel,
        out_shape=tuple(out_shape),
        grid_spec=grid_spec,
        # TODO(synk): at real L/D also set vmem_limit_bytes (scoped default is
        #             16/32 MiB on v5e / v6e-v7x) and tile Lq/Lk.
        compiler_params=pltpu.CompilerParams(
            dimension_semantics=("parallel",)),
    )(q, k, v, wq3, wk3, wv3, wp3,
      params["proj_b"], params["gamma"], params["beta"])

    if return_attn:
        out, attn_hb = result
        # (H, B, Lq, Lk) -> (H*B, Lq, Lk): contiguous, matches torch head-major.
        return out, attn_hb.reshape(H * B, Lq, Lk)
    (out,) = result
    return out, None


# ------------------------------ pure-JAX reference ----------------------------

def reference(q, k, v, params, d_k, eps=1e-3):
    H = params["w_q"].shape[0]
    B, Lq, D = q.shape
    qs = jnp.einsum("bld,hdk->hblk", q, params["w_q"])
    ks = jnp.einsum("bld,hdk->hblk", k, params["w_k"])
    vs = jnp.einsum("bld,hdv->hblv", v, params["w_v"])
    s = jnp.einsum("hbqd,hbkd->hbqk", qs, ks) / np.sqrt(d_k)
    p = jax.nn.softmax(s, axis=-1)
    o = jnp.einsum("hbqk,hbkv->hbqv", p, vs)
    cat = jnp.transpose(o, (1, 2, 0, 3)).reshape(B, Lq, -1)
    y = cat @ params["proj_w_t"] + params["proj_b"][0]
    z = q + y
    mean = z.mean(-1, keepdims=True)
    std = jnp.sqrt(((z - mean) ** 2).sum(-1, keepdims=True) / (D - 1))
    ln = (z - mean) / (std + eps)
    out = params["gamma"][0] * ln + params["beta"][0]
    return out, p.reshape(H * B, Lq, -1)


# ----------------------------------- main --------------------------------------

if __name__ == "__main__":
    d_k = d_v = 8
    d_model = 32
    n_heads = 4
    B, L = 2, 8

    key = jax.random.PRNGKey(0)
    ks = jax.random.split(key, 8)

    # xavier_normal for (H, d_model, d_k): fan_in=d_model*d_k, fan_out=H*d_k
    def xavier(kk, shape):
        fan_in = shape[1] * shape[2]
        fan_out = shape[0] * shape[2]
        std = float(np.sqrt(2.0 / (fan_in + fan_out)))
        return jax.random.normal(kk, shape, jnp.float32) * std

    params = {
        "w_q": xavier(ks[0], (n_heads, d_model, d_k)),
        "w_k": xavier(ks[1], (n_heads, d_model, d_k)),
        "w_v": xavier(ks[2], (n_heads, d_model, d_v)),
        # nn.Linear(n_heads*d_v, d_model): store weight^T so kernel does x @ W^T.
        "proj_w_t": (jax.random.uniform(ks[3], (n_heads * d_v, d_model),
                                        jnp.float32, -1.0, 1.0)
                     / np.sqrt(n_heads * d_v)),
        "proj_b": (jax.random.uniform(ks[4], (1, d_model), jnp.float32,
                                      -1.0, 1.0) / np.sqrt(n_heads * d_v)),
        "gamma": jnp.ones((1, d_model), jnp.float32),
        "beta": jnp.zeros((1, d_model), jnp.float32),
    }

    q = jax.random.normal(ks[5], (B, L, d_model), jnp.float32)
    k = jax.random.normal(ks[6], (B, L, d_model), jnp.float32)
    v = jax.random.normal(ks[7], (B, L, d_model), jnp.float32)

    # Default fast path: no attention-probability writeback.
    out_only, _ = multi_head_attention(q, k, v, params, d_k, attn_mask=None)
    out_only = jax.block_until_ready(out_only)

    # Full path: probs emitted as bf16, one store per grid step.
    out, attn = multi_head_attention(q, k, v, params, d_k, attn_mask=None,
                                     return_attn=True)
    out = jax.block_until_ready(out)
    attn = jax.block_until_ready(attn)

    out_ref, attn_ref = reference(q, k, v, params, d_k)
    # bf16 MXU operands + approx reciprocals => relaxed tolerance vs f32 ref.
    np.testing.assert_allclose(np.asarray(out), np.asarray(out_ref),
                               rtol=2e-2, atol=2e-2)
    np.testing.assert_allclose(np.asarray(out_only), np.asarray(out_ref),
                               rtol=2e-2, atol=2e-2)
    np.testing.assert_allclose(np.asarray(attn.astype(jnp.float32)),
                               np.asarray(attn_ref), rtol=2e-2, atol=2e-2)

    print("KERNEL_OK")
</pallas_src>

<mosaic_0001>
module attributes {stable_mosaic.version = 11 : i64} {
  func.func @_mha_fused_kernel(%arg0: i32, %arg1: memref<1x8x32xf32, #tpu.memory_space<vmem>>, %arg2: memref<1x8x32xf32, #tpu.memory_space<vmem>>, %arg3: memref<1x8x32xf32, #tpu.memory_space<vmem>>, %arg4: memref<4x32x8xbf16, #tpu.memory_space<vmem>>, %arg5: memref<4x32x8xbf16, #tpu.memory_space<vmem>>, %arg6: memref<4x32x8xbf16, #tpu.memory_space<vmem>>, %arg7: memref<4x8x32xbf16, #tpu.memory_space<vmem>>, %arg8: memref<1x32xf32, #tpu.memory_space<vmem>>, %arg9: memref<1x32xf32, #tpu.memory_space<vmem>>, %arg10: memref<1x32xf32, #tpu.memory_space<vmem>>, %arg11: memref<1x8x32xf32, #tpu.memory_space<vmem>>) attributes {dimension_semantics = [#tpu.dimension_semantics<parallel>], iteration_bounds = array<i64: 2>, scalar_prefetch = 0 : i64, scratch_operands = 0 : i64, tpu.core_type = #tpu.core_type<tc>, window_params = [{transform_indices = @transform_0, window_bounds = array<i64: 1, 8, 32>}, {transform_indices = @transform_1, window_bounds = array<i64: 1, 8, 32>}, {transform_indices = @transform_2, window_bounds = array<i64: 1, 8, 32>}, {pipeline_mode = #tpu.pipeline_mode<synchronous>, transform_indices = @transform_3, window_bounds = array<i64: 4, 32, 8>}, {pipeline_mode = #tpu.pipeline_mode<synchronous>, transform_indices = @transform_4, window_bounds = array<i64: 4, 32, 8>}, {pipeline_mode = #tpu.pipeline_mode<synchronous>, transform_indices = @transform_5, window_bounds = array<i64: 4, 32, 8>}, {pipeline_mode = #tpu.pipeline_mode<synchronous>, transform_indices = @transform_6, window_bounds = array<i64: 4, 8, 32>}, {pipeline_mode = #tpu.pipeline_mode<synchronous>, transform_indices = @transform_7, window_bounds = array<i64: 1, 32>}, {pipeline_mode = #tpu.pipeline_mode<synchronous>, transform_indices = @transform_8, window_bounds = array<i64: 1, 32>}, {pipeline_mode = #tpu.pipeline_mode<synchronous>, transform_indices = @transform_9, window_bounds = array<i64: 1, 32>}, {transform_indices = @transform_10, window_bounds = array<i64: 1, 8, 32>}]} {
    %c0 = arith.constant 0 : index
    %c0_0 = arith.constant 0 : index
    %c0_1 = arith.constant 0 : index
    %0 = vector.load %arg1[%c0, %c0_0, %c0_1] : memref<1x8x32xf32, #tpu.memory_space<vmem>>, vector<1x8x32xf32>
    %1 = vector.shape_cast %0 : vector<1x8x32xf32> to vector<8x32xf32>
    %c0_2 = arith.constant 0 : index
    %c0_3 = arith.constant 0 : index
    %c0_4 = arith.constant 0 : index
    %2 = vector.load %arg2[%c0_2, %c0_3, %c0_4] : memref<1x8x32xf32, #tpu.memory_space<vmem>>, vector<1x8x32xf32>
    %3 = vector.shape_cast %2 : vector<1x8x32xf32> to vector<8x32xf32>
    %c0_5 = arith.constant 0 : index
    %c0_6 = arith.constant 0 : index
    %c0_7 = arith.constant 0 : index
    %4 = vector.load %arg3[%c0_5, %c0_6, %c0_7] : memref<1x8x32xf32, #tpu.memory_space<vmem>>, vector<1x8x32xf32>
    %5 = vector.shape_cast %4 : vector<1x8x32xf32> to vector<8x32xf32>
    %6 = arith.truncf %1 : vector<8x32xf32> to vector<8x32xbf16>
    %7 = vector.shape_cast %6 : vector<8x32xbf16> to vector<1x8x32xbf16>
    %8 = vector.broadcast %7 : vector<1x8x32xbf16> to vector<4x8x32xbf16>
    %9 = arith.truncf %3 : vector<8x32xf32> to vector<8x32xbf16>
    %10 = vector.shape_cast %9 : vector<8x32xbf16> to vector<1x8x32xbf16>
    %11 = vector.broadcast %10 : vector<1x8x32xbf16> to vector<4x8x32xbf16>
    %12 = arith.truncf %5 : vector<8x32xf32> to vector<8x32xbf16>
    %13 = vector.shape_cast %12 : vector<8x32xbf16> to vector<1x8x32xbf16>
    %14 = vector.broadcast %13 : vector<1x8x32xbf16> to vector<4x8x32xbf16>
    %c0_8 = arith.constant 0 : index
    %c0_9 = arith.constant 0 : index
    %c0_10 = arith.constant 0 : index
    %15 = vector.load %arg4[%c0_8, %c0_9, %c0_10] : memref<4x32x8xbf16, #tpu.memory_space<vmem>>, vector<4x32x8xbf16>
    "tpu.trace_start"() <{level = 10 : i32, message = "hld,hdk->hlk"}> : () -> ()
    %cst = arith.constant dense<0.000000e+00> : vector<4x8x8xf32>
    %16 = tpu.matmul %8, %15, %cst {dimension_numbers = #tpu.dot_dimension_numbers<[2], [1], [1], [2], [0, 0, 0, 1, 1, 2], [0], [0]>} : vector<4x8x32xbf16>, vector<4x32x8xbf16>, vector<4x8x8xf32> -> vector<4x8x8xf32>
    "tpu.trace_stop"() : () -> ()
    %c0_11 = arith.constant 0 : index
    %c0_12 = arith.constant 0 : index
    %c0_13 = arith.constant 0 : index
    %17 = vector.load %arg5[%c0_11, %c0_12, %c0_13] : memref<4x32x8xbf16, #tpu.memory_space<vmem>>, vector<4x32x8xbf16>
    "tpu.trace_start"() <{level = 10 : i32, message = "hld,hdk->hlk"}> : () -> ()
    %cst_14 = arith.constant dense<0.000000e+00> : vector<4x8x8xf32>
    %18 = tpu.matmul %11, %17, %cst_14 {dimension_numbers = #tpu.dot_dimension_numbers<[2], [1], [1], [2], [0, 0, 0, 1, 1, 2], [0], [0]>} : vector<4x8x32xbf16>, vector<4x32x8xbf16>, vector<4x8x8xf32> -> vector<4x8x8xf32>
    "tpu.trace_stop"() : () -> ()
    %c0_15 = arith.constant 0 : index
    %c0_16 = arith.constant 0 : index
    %c0_17 = arith.constant 0 : index
    %19 = vector.load %arg6[%c0_15, %c0_16, %c0_17] : memref<4x32x8xbf16, #tpu.memory_space<vmem>>, vector<4x32x8xbf16>
    "tpu.trace_start"() <{level = 10 : i32, message = "hld,hdv->hlv"}> : () -> ()
    %cst_18 = arith.constant dense<0.000000e+00> : vector<4x8x8xf32>
    %20 = tpu.matmul %14, %19, %cst_18 {dimension_numbers = #tpu.dot_dimension_numbers<[2], [1], [1], [2], [0, 0, 0, 1, 1, 2], [0], [0]>} : vector<4x8x32xbf16>, vector<4x32x8xbf16>, vector<4x8x8xf32> -> vector<4x8x8xf32>
    "tpu.trace_stop"() : () -> ()
    %cst_19 = arith.constant 0.353553385 : f32
    %21 = vector.broadcast %cst_19 : f32 to vector<4x8x8xf32>
    %22 = arith.mulf %16, %21 : vector<4x8x8xf32>
    %23 = arith.truncf %22 : vector<4x8x8xf32> to vector<4x8x8xbf16>
    %24 = arith.truncf %18 : vector<4x8x8xf32> to vector<4x8x8xbf16>
    %25 = arith.truncf %20 : vector<4x8x8xf32> to vector<4x8x8xbf16>
    "tpu.trace_start"() <{level = 10 : i32, message = "hqd,hkd->hqk"}> : () -> ()
    %cst_20 = arith.constant dense<0.000000e+00> : vector<4x8x8xf32>
    %26 = tpu.matmul %23, %24, %cst_20 {dimension_numbers = #tpu.dot_dimension_numbers<[2], [2], [1], [1], [0, 0, 0, 1, 1, 1], [0], [0]>} : vector<4x8x8xbf16>, vector<4x8x8xbf16>, vector<4x8x8xf32> -> vector<4x8x8xf32>
    "tpu.trace_stop"() : () -> ()
    %cst_21 = arith.constant dense<0xFF800000> : vector<4x8xf32>
    %27 = vector.multi_reduction <maximumf>, %26, %cst_21 [2] : vector<4x8x8xf32> to vector<4x8xf32>
    %28 = vector.shape_cast %27 : vector<4x8xf32> to vector<4x8x1xf32>
    %29 = vector.broadcast %28 : vector<4x8x1xf32> to vector<4x8x8xf32>
    %30 = arith.subf %26, %29 : vector<4x8x8xf32>
    %31 = math.exp %30 : vector<4x8x8xf32>
    %cst_22 = arith.constant dense<0.000000e+00> : vector<4x8xf32>
    %32 = vector.multi_reduction <add>, %31, %cst_22 [2] : vector<4x8x8xf32> to vector<4x8xf32>
    %33 = vector.shape_cast %32 : vector<4x8xf32> to vector<4x8x1xf32>
    %34 = tpu.reciprocal %33 {approx = true} : vector<4x8x1xf32> -> vector<4x8x1xf32>
    %35 = vector.broadcast %34 : vector<4x8x1xf32> to vector<4x8x8xf32>
    %36 = arith.mulf %31, %35 : vector<4x8x8xf32>
    %37 = arith.truncf %36 : vector<4x8x8xf32> to vector<4x8x8xbf16>
    "tpu.trace_start"() <{level = 10 : i32, message = "hqk,hkv->hqv"}> : () -> ()
    %cst_23 = arith.constant dense<0.000000e+00> : vector<4x8x8xf32>
    %38 = tpu.matmul %37, %25, %cst_23 {dimension_numbers = #tpu.dot_dimension_numbers<[2], [1], [1], [2], [0, 0, 0, 1, 1, 2], [0], [0]>} : vector<4x8x8xbf16>, vector<4x8x8xbf16>, vector<4x8x8xf32> -> vector<4x8x8xf32>
    "tpu.trace_stop"() : () -> ()
    %39 = arith.truncf %38 : vector<4x8x8xf32> to vector<4x8x8xbf16>
    %c0_24 = arith.constant 0 : index
    %c0_25 = arith.constant 0 : index
    %c0_26 = arith.constant 0 : index
    %40 = vector.load %arg7[%c0_24, %c0_25, %c0_26] : memref<4x8x32xbf16, #tpu.memory_space<vmem>>, vector<4x8x32xbf16>
    "tpu.trace_start"() <{level = 10 : i32, message = "hqv,hvd->hqd"}> : () -> ()
    %cst_27 = arith.constant dense<0.000000e+00> : vector<4x8x32xf32>
    %41 = tpu.matmul %39, %40, %cst_27 {dimension_numbers = #tpu.dot_dimension_numbers<[2], [1], [1], [2], [0, 0, 0, 1, 1, 2], [0], [0]>} : vector<4x8x8xbf16>, vector<4x8x32xbf16>, vector<4x8x32xf32> -> vector<4x8x32xf32>
    "tpu.trace_stop"() : () -> ()
    %cst_28 = arith.constant dense<0.000000e+00> : vector<8x32xf32>
    %42 = vector.multi_reduction <add>, %41, %cst_28 [0] : vector<4x8x32xf32> to vector<8x32xf32>
    %43 = arith.addf %1, %42 : vector<8x32xf32>
    %c0_29 = arith.constant 0 : index
    %c0_30 = arith.constant 0 : index
    %44 = vector.load %arg8[%c0_29, %c0_30] : memref<1x32xf32, #tpu.memory_space<vmem>>, vector<1x32xf32>
    %45 = vector.broadcast %44 : vector<1x32xf32> to vector<8x32xf32>
    %46 = arith.addf %43, %45 : vector<8x32xf32>
    %cst_31 = arith.constant dense<0.000000e+00> : vector<8xf32>
    %47 = vector.multi_reduction <add>, %46, %cst_31 [1] : vector<8x32xf32> to vector<8xf32>
    %48 = vector.shape_cast %47 : vector<8xf32> to vector<8x1xf32>
    %cst_32 = arith.constant 3.200000e+01 : f32
    %49 = vector.broadcast %cst_32 : f32 to vector<8x1xf32>
    %50 = arith.divf %48, %49 : vector<8x1xf32>
    %51 = vector.broadcast %50 : vector<8x1xf32> to vector<8x32xf32>
    %52 = arith.subf %46, %51 : vector<8x32xf32>
    %53 = arith.mulf %52, %52 : vector<8x32xf32>
    %cst_33 = arith.constant dense<0.000000e+00> : vector<8xf32>
    %54 = vector.multi_reduction <add>, %53, %cst_33 [1] : vector<8x32xf32> to vector<8xf32>
    %55 = vector.shape_cast %54 : vector<8xf32> to vector<8x1xf32>
    %cst_34 = arith.constant 0.0322580636 : f32
    %56 = vector.broadcast %cst_34 : f32 to vector<8x1xf32>
    %57 = arith.mulf %55, %56 : vector<8x1xf32>
    %58 = math.sqrt %57 : vector<8x1xf32>
    %cst_35 = arith.constant 1.000000e-03 : f32
    %59 = vector.broadcast %cst_35 : f32 to vector<8x1xf32>
    %60 = arith.addf %58, %59 : vector<8x1xf32>
    %61 = tpu.reciprocal %60 {approx = true} : vector<8x1xf32> -> vector<8x1xf32>
    %c0_36 = arith.constant 0 : index
    %c0_37 = arith.constant 0 : index
    %62 = vector.load %arg9[%c0_36, %c0_37] : memref<1x32xf32, #tpu.memory_space<vmem>>, vector<1x32xf32>
    %63 = vector.broadcast %61 : vector<8x1xf32> to vector<8x32xf32>
    %64 = arith.mulf %52, %63 : vector<8x32xf32>
    %65 = vector.broadcast %62 : vector<1x32xf32> to vector<8x32xf32>
    %66 = arith.mulf %65, %64 : vector<8x32xf32>
    %c0_38 = arith.constant 0 : index
    %c0_39 = arith.constant 0 : index
    %67 = vector.load %arg10[%c0_38, %c0_39] : memref<1x32xf32, #tpu.memory_space<vmem>>, vector<1x32xf32>
    %68 = vector.broadcast %67 : vector<1x32xf32> to vector<8x32xf32>
    %69 = arith.addf %66, %68 : vector<8x32xf32>
    %c0_40 = arith.constant 0 : index
    %c0_41 = arith.constant 0 : index
    %c0_42 = arith.constant 0 : index
    %70 = vector.load %arg11[%c0_40, %c0_41, %c0_42] : memref<1x8x32xf32, #tpu.memory_space<vmem>>, vector<1x8x32xf32>
    %71 = vector.shape_cast %70 : vector<1x8x32xf32> to vector<8x32xf32>
    %72 = vector.shape_cast %69 : vector<8x32xf32> to vector<1x8x32xf32>
    tpu.vector_store %arg11[%c0_40, %c0_41, %c0_42], %72 {strides = array<i32>} : memref<1x8x32xf32, #tpu.memory_space<vmem>>, vector<1x8x32xf32>,
    return
  }
  func.func @transform_0(%arg0: i32) -> (i32, i32, i32) {
    %c0_i32 = arith.constant 0 : i32
    %c0_i32_0 = arith.constant 0 : i32
    %c0_i32_1 = arith.constant 0 : i32
    return %arg0, %c0_i32, %c0_i32_0 : i32, i32, i32
  }
  func.func @transform_1(%arg0: i32) -> (i32, i32, i32) {
    %c0_i32 = arith.constant 0 : i32
    %c0_i32_0 = arith.constant 0 : i32
    %c0_i32_1 = arith.constant 0 : i32
    return %arg0, %c0_i32, %c0_i32_0 : i32, i32, i32
  }
  func.func @transform_2(%arg0: i32) -> (i32, i32, i32) {
    %c0_i32 = arith.constant 0 : i32
    %c0_i32_0 = arith.constant 0 : i32
    %c0_i32_1 = arith.constant 0 : i32
    return %arg0, %c0_i32, %c0_i32_0 : i32, i32, i32
  }
  func.func @transform_3(%arg0: i32) -> (i32, i32, i32) {
    %c0_i32 = arith.constant 0 : i32
    %c0_i32_0 = arith.constant 0 : i32
    %c0_i32_1 = arith.constant 0 : i32
    %c0_i32_2 = arith.constant 0 : i32
    return %c0_i32, %c0_i32_0, %c0_i32_1 : i32, i32, i32
  }
  func.func @transform_4(%arg0: i32) -> (i32, i32, i32) {
    %c0_i32 = arith.constant 0 : i32
    %c0_i32_0 = arith.constant 0 : i32
    %c0_i32_1 = arith.constant 0 : i32
    %c0_i32_2 = arith.constant 0 : i32
    return %c0_i32, %c0_i32_0, %c0_i32_1 : i32, i32, i32
  }
  func.func @transform_5(%arg0: i32) -> (i32, i32, i32) {
    %c0_i32 = arith.constant 0 : i32
    %c0_i32_0 = arith.constant 0 : i32
    %c0_i32_1 = arith.constant 0 : i32
    %c0_i32_2 = arith.constant 0 : i32
    return %c0_i32, %c0_i32_0, %c0_i32_1 : i32, i32, i32
  }
  func.func @transform_6(%arg0: i32) -> (i32, i32, i32) {
    %c0_i32 = arith.constant 0 : i32
    %c0_i32_0 = arith.constant 0 : i32
    %c0_i32_1 = arith.constant 0 : i32
    %c0_i32_2 = arith.constant 0 : i32
    return %c0_i32, %c0_i32_0, %c0_i32_1 : i32, i32, i32
  }
  func.func @transform_7(%arg0: i32) -> (i32, i32) {
    %c0_i32 = arith.constant 0 : i32
    %c0_i32_0 = arith.constant 0 : i32
    %c0_i32_1 = arith.constant 0 : i32
    return %c0_i32, %c0_i32_0 : i32, i32
  }
  func.func @transform_8(%arg0: i32) -> (i32, i32) {
    %c0_i32 = arith.constant 0 : i32
    %c0_i32_0 = arith.constant 0 : i32
    %c0_i32_1 = arith.constant 0 : i32
    return %c0_i32, %c0_i32_0 : i32, i32
  }
  func.func @transform_9(%arg0: i32) -> (i32, i32) {
    %c0_i32 = arith.constant 0 : i32
    %c0_i32_0 = arith.constant 0 : i32
    %c0_i32_1 = arith.constant 0 : i32
    return %c0_i32, %c0_i32_0 : i32, i32
  }
  func.func @transform_10(%arg0: i32) -> (i32, i32, i32) {
    %c0_i32 = arith.constant 0 : i32
    %c0_i32_0 = arith.constant 0 : i32
    %c0_i32_1 = arith.constant 0 : i32
    return %arg0, %c0_i32, %c0_i32_0 : i32, i32, i32
  }
}

</mosaic_0001>

<bundles_post_ra>
// kernel: tpu_custom_call.1
= control target key start
LH: loop header
LB: loop body
LE: loop exit
PB: predicated region body
PF: predicated region fallthrough
CT: control target
= control target key end

     0   :  { %s2705_s0 = inlined_call_operand.vmem [shape: f32[2,8,32], index: 0, kind: input, shape index: {}]   ;;  %s2706_s1 = inlined_call_operand.vmem [shape: f32[2,8,32], index: 1, kind: input, shape index: {}]   ;;  %s2707_s2 = inlined_call_operand.vmem [shape: f32[2,8,32], index: 2, kind: input, shape index: {}]   ;;  %s2708_s3 = inlined_call_operand.vmem [shape: bf16[4,32,8], index: 3, kind: input, shape index: {}]   ;;  %s2709_s4 = inlined_call_operand.vmem [shape: bf16[4,32,8], index: 4, kind: input, shape index: {}]   ;;  %s2710_s5 = inlined_call_operand.vmem [shape: bf16[4,32,8], index: 5, kind: input, shape index: {}]   ;;  %s2711_s6 = inlined_call_operand.vmem [shape: bf16[4,8,32], index: 6, kind: input, shape index: {}]   ;;  %s2712_s7 = inlined_call_operand.vmem [shape: f32[1,32], index: 7, kind: input, shape index: {}]   ;;  %s2713_s8 = inlined_call_operand.vmem [shape: f32[1,32], index: 8, kind: input, shape index: {}]   ;;  %s2714_s9 = inlined_call_operand.vmem [shape: f32[1,32], index: 9, kind: input, shape index: {}]   ;;  %s2715_s10 = inlined_call_operand.hbm [shape: f32[2,8,32], index: 10, kind: output, shape index: {}]  }
   0x1   :  { %2716 = sst [smem:[#allocation5_spill]] %s2705_s0 }
   0x2   :  { %15 = vsyncpa [#allocation3], 0 }
   0x3   :  { %17 = vsyncpa [#allocation3 + $0x1], 0  ;;  %s2353_s13 = smov 0   ;;  %s2355_s14 = smov 0  }
   0x4   :  { %s2357_s15 = smov 0   ;;  %s2359_s16 = smov 0  }
   0x5 LB: > { %s2374_s17 = sadd.s32 4294967295, %s2293_s16   ;;  %s1855_s18 = sadd.s32 4294967294, %s2293_s16   ;;  %s2293_s16 = sphi %s2359_s16, %s2723_s16   ;;  %s2289_s15 = sphi %s2357_s15, %s2722_s15   ;;  %s2285_s14 = sphi %s2355_s14, %s2721_s14   ;;  %s2281_s13 = sphi %s2353_s13, %s2720_s13  }
   0x6   : > { %s2378_s19 = sadd.s32 1, %s2293_s16   ;;  %s255_s20 = sadd.s32 1, %s2289_s15 }
   0x7   : > { %s252_s21 = ssub.s32 %s2293_s16, %s2378_s19  ;;  %p265_p0 = scmp.ne.s32.totalorder %s2289_s15, %s2285_s14 }
   0x8   : > { %p253_p1 = scmp.eq.s32.totalorder %s252_s21, 0  ;;  %p266_p2 = scmp.eq.s32.totalorder %s2374_s17, 1 }
   0x9   : > { %p271_p3 = scmp.ne.s32.totalorder %s2285_s14, %s2281_s13  ;;  %p272_p4 = scmp.eq.s32.totalorder %s1855_s18, 1 }
   0xa   : > { %s2389_s22 = scalar_select %p253_p1, %s2289_s15, %s255_s20  }
   0xb   : > { %p2391_p5 = por %p266_p2, %p265_p0  ;;  %p2395_p6 = por %p272_p4, %p271_p3 }
   0xc   : > { %p1858_p7 = scmp.ge.s32.totalorder %s2293_s16, 1  ;;  %p332_p8 = scmp.lt.s32.totalorder %s2293_s16, 3 }
   0xe   : > { %p333_p9 = pnand %p1858_p7, %p332_p8 }
   0xf   : > { %v2187_v0 = vld [vmem:[%s2708_s3] sm:$0xff] (!%p333_p9)   ;;  %v2295_v1 = vmov (!%p333_p9), 0.0   ;;  %v2188_v2 = vld [vmem:[%s2708_s3 + $0x10] sm:$0xff] (!%p333_p9)   ;;  %v2189_v3 = vld [vmem:[%s2708_s3 + $0x8] sm:$0xff] (!%p333_p9)   ;;  %vm2296_vm0 = vmmov (!%p333_p9), 0   ;;  %p377_p10 = scmp.lt.s32.totalorder (!%p333_p9), %s2374_s17, 1 }
  0x10   : > { %336 = sbr.rel (%p333_p9) target bundleno = 1583 (0x62f), region = 60  ;;  %1978 = vmatprep.subr.bf16.mxu0 (!%p333_p9), %v2295_v1  ;;  %1986 = vmatprep.subr.bf16.mxu1 (!%p333_p9), %v2295_v1  ;;  %v2190_v4 = vld [vmem:[%s2708_s3 + $0x18] sm:$0xff] (!%p333_p9)   ;;  %v2191_v5 = vld [vmem:[%s2708_s3 + $0x20] sm:$0xff] (!%p333_p9)   ;;  %s2719_s0 = sld [smem:[#allocation5_spill]] (!%p333_p9)  ;;  %v2192_v6 = vld [vmem:[%s2708_s3 + $0x30] sm:$0xff] (!%p333_p9)   ;;  %vm424_vm1 = vcmask (!%p333_p9), 261120  }
  0x11   : > { %1979 = vmatpush3.bf16.msra.mxu0 (!%p333_p9), %v2187_v0  ;;  %1982 = vmatprep.mubr.msk.bf16.mxu0 (!%p333_p9), %vm2296_vm0, %v2295_v1  ;;  %v2193_v9 = vld [vmem:[%s2708_s3 + $0x28] sm:$0xff] (!%p333_p9)   ;;  %v2194_v10 = vld [vmem:[%s2708_s3 + $0x38] sm:$0xff] (!%p333_p9)   ;;  %v2195_v11 = vld [vmem:[%s2709_s4] sm:$0xff] (!%p333_p9)   ;;  %vm1094_vm2 = vcmask (!%p333_p9), 64512   ;;  %vm1330_vm3 = vcmask (!%p333_p9), 1043456   ;;  %s374_s11 = sand.u32 (!%p333_p9), 1, %s2285_s14  }
  0x12   : > { %1987 = vmatpush3.bf16.msra.mxu1 (!%p333_p9), %v2188_v2  ;;  %1980 = vmatprep.subr.bf16.mxu0 (!%p333_p9), %v2295_v1  ;;  %v2196_v12 = vld [vmem:[%s2709_s4 + $0x10] sm:$0xff] (!%p333_p9)   ;;  %v2197_v13 = vld [vmem:[%s2709_s4 + $0x8] sm:$0xff] (!%p333_p9)   ;;  %v2198_v14 = vld [vmem:[%s2709_s4 + $0x18] sm:$0xff] (!%p333_p9)   ;;  %s1915_s27 = sshll.u32 (!%p333_p9), %s2374_s17, 7 }
  0x13   : > { %1988 = vmatprep.subr.bf16.mxu1 (!%p333_p9), %v2295_v1  ;;  %1990 = vmatprep.mubr.msk.bf16.mxu1 (!%p333_p9), %vm2296_vm0, %v2295_v1  ;;  %v2199_v17 = vld [vmem:[%s2709_s4 + $0x20] sm:$0xff] (!%p333_p9)   ;;  %v2200_v18 = vld [vmem:[%s2709_s4 + $0x30] sm:$0xff] (!%p333_p9)   ;;  %v2201_v19 = vld [vmem:[%s2709_s4 + $0x28] sm:$0xff] (!%p333_p9)  }
  0x14   : > { %v2202_v20 = vld [vmem:[%s2709_s4 + $0x38] sm:$0xff] (!%p333_p9)   ;;  %v2203_v21 = vld [vmem:[%s2710_s5] sm:$0xff] (!%p333_p9)   ;;  %v2204_v22 = vld [vmem:[%s2710_s5 + $0x10] sm:$0xff] (!%p333_p9)  }
  0x15   : > { %1981 = vmatpush3.bf16.msra.mxu0 (!%p333_p9), %v2189_v3  ;;  %v2205_v23 = vld [vmem:[%s2710_s5 + $0x8] sm:$0xff] (!%p333_p9)   ;;  %v2206_v24 = vld [vmem:[%s2710_s5 + $0x18] sm:$0xff] (!%p333_p9)   ;;  %v2207_v27 = vld [vmem:[%s2710_s5 + $0x20] sm:$0xff] (!%p333_p9)  }
  0x16   : > { %1989 = vmatpush3.bf16.msra.mxu1 (!%p333_p9), %v2190_v4  ;;  %1994 = vmatprep.subr.bf16.mxu0 (!%p333_p9), %v2295_v1  ;;  %v2208_v28 = vld [vmem:[%s2710_s5 + $0x30] sm:$0xff] (!%p333_p9)   ;;  %v2209_v29 = vld [vmem:[%s2710_s5 + $0x28] sm:$0xff] (!%p333_p9)   ;;  %v2210_v30 = vld [vmem:[%s2710_s5 + $0x38] sm:$0xff] (!%p333_p9)  }
  0x17   : > { %s378_s18 = scalar_select %p377_p10, %s2374_s17, 1  ;;  %2002 = vmatprep.subr.bf16.mxu1 %v2295_v1 }
  0x18   : > { %s2297_s17 = smov [#allocation2]  }
  0x19   : > { %s2423_s20 = sshll.u32 %s378_s18, 3  ;;  %s1759_s18 = scalar_lea.sflag [#allocation3], %s374_s11 }
  0x1a   : > { %s380_s28 = scalar_lea.vmem %s2719_s0, %s2423_s20  ;;  %s384_s29 = scalar_lea.vmem %s2706_s1, %s2423_s20 }
  0x1b   : > { %v2436_v7 = vld [vmem:[%s380_s28] sm:$0xff]  ;;  %s388_s12 = scalar_lea.vmem %s2707_s2, %s2423_s20  ;;  %s2662_s0 = scalar_lea.hbm %s2715_s10, %s1915_s27 }
  0x1c   : > { %v393_v8 = vpack.c.bf16 %v2436_v7, %v2436_v7  ;;  %v391_v15 = vld [vmem:[%s384_s29] sm:$0xff] }
  0x1d   : > { %v394_v16 = vpack.c.bf16 %v391_v15, %v391_v15  ;;  %v392_v25 = vld [vmem:[%s388_s12] sm:$0xff]  ;;  %s1859_s12 = sshll.u32 %s374_s11, 3 }
  0x1e   : > { %1983 = vmatmul.mubr.msk.bf16.vlgmr.msra.gmra.mrb[0].mxu0 %vm424_vm1, %v393_v8  ;;  %1991 = vmatmul.mubr.msk.bf16.vlgmr.msra.gmra.mrb[0].mxu1 %vm424_vm1, %v393_v8  ;;  %v395_v26 = vpack.c.bf16 %v392_v25, %v392_v25  ;;  %s376_s28 = scalar_lea.vmem [#allocation2], %s1859_s12  ;;  %s2235_s12 = sshll.u32 %s2297_s17, 4  ;;  %s2236_s12 = int_to_ptr.vmem [resolvable:$false] %s2235_s12 }
  0x1f   : > { %1995 = vmatpush3.bf16.msra.mxu0 %v2191_v5  ;;  %2003 = vmatpush3.bf16.msra.mxu1 %v2192_v6  ;;  %s1772_s20 = sshll.u32 %s376_s28, 4  ;;  %s2237_s25 = scalar_lea.vmem %s2236_s12, 256  ;;  %s2664_s20 = int_to_ptr.vmem [resolvable:$true] %s1772_s20 }
  0x20   : > { %1996 = vmatprep.subr.bf16.mxu0 %v2295_v1  ;;  %2004 = vmatprep.subr.bf16.mxu1 %v2295_v1  ;;  %s2231_s21 = scalar_lea.vmem %s2664_s20, 128  ;;  %p2238_p0 = scmp.lt.s32.totalorder %s2664_s20, %s2236_s12 }
  0x21   : > { %1998 = vmatprep.mubr.msk.bf16.mxu0 %vm2296_vm0, %v2295_v1  ;;  %2006 = vmatprep.mubr.msk.bf16.mxu1 %vm2296_vm0, %v2295_v1  ;;  %p2232_p11 = scmp.ne.s32.totalorder %s2664_s20, %s2231_s21  ;;  %p2239_p1 = scmp.lt.s32.totalorder %s2237_s25, %s2231_s21 }
  0x23   : > { %1997 = vmatpush3.bf16.msra.mxu0 %v2193_v9  ;;  %2005 = vmatpush3.bf16.msra.mxu1 %v2194_v10  ;;  %p2233_p12 = pnand %p2232_p11, %p2391_p5  ;;  %p2240_p2 = por %p2239_p1, %p2238_p0 }
  0x24   : > { %2010 = vmatprep.subr.bf16.mxu0 %v2295_v1  ;;  %2018 = vmatprep.subr.bf16.mxu1 %v2295_v1 }
  0x25   : > { %p2234_p13 = pneg %p2233_p12 }
  0x26   : > { %1999 = vmatmul.mubr.msk.bf16.vlgmr.msra.gmra.mrb[4].mxu0 %vm424_vm1, %v393_v8  ;;  %2007 = vmatmul.mubr.msk.bf16.vlgmr.msra.gmra.mrb[4].mxu1 %vm424_vm1, %v393_v8 }
  0x27   : > { %2011 = vmatpush3.bf16.msra.mxu0 %v2195_v11  ;;  %2019 = vmatpush3.bf16.msra.mxu1 %v2196_v12  ;;  %p2241_p3 = pnand %p2240_p2, %p2234_p13 }
  0x28   : > { %2012 = vmatprep.subr.bf16.mxu0 %v2295_v1  ;;  %2020 = vmatprep.subr.bf16.mxu1 %v2295_v1 }
  0x29   : > { %2014 = vmatprep.mubr.msk.bf16.mxu0 %vm2296_vm0, %v2295_v1  ;;  %2022 = vmatprep.mubr.msk.bf16.mxu1 %vm2296_vm0, %v2295_v1 }
  0x2b   : > { %2013 = vmatpush3.bf16.msra.mxu0 %v2197_v13  ;;  %2021 = vmatpush3.bf16.msra.mxu1 %v2198_v14 }
  0x2c   : > { %2026 = vmatprep.subr.bf16.mxu0 %v2295_v1  ;;  %2034 = vmatprep.subr.bf16.mxu1 %v2295_v1 }
  0x2e   : > { %2015 = vmatmul.mubr.msk.bf16.vlgmr.msra.gmra.mrb[8].mxu0 %vm424_vm1, %v394_v16  ;;  %2023 = vmatmul.mubr.msk.bf16.vlgmr.msra.gmra.mrb[8].mxu1 %vm424_vm1, %v394_v16 }
  0x2f   : > { %2027 = vmatpush3.bf16.msra.mxu0 %v2199_v17  ;;  %2035 = vmatpush3.bf16.msra.mxu1 %v2200_v18 }
  0x30   : > { %2028 = vmatprep.subr.bf16.mxu0 %v2295_v1  ;;  %2036 = vmatprep.subr.bf16.mxu1 %v2295_v1 }
  0x31   : > { %2030 = vmatprep.mubr.msk.bf16.mxu0 %vm2296_vm0, %v2295_v1  ;;  %2038 = vmatprep.mubr.msk.bf16.mxu1 %vm2296_vm0, %v2295_v1 }
  0x33   : > { %2029 = vmatpush3.bf16.msra.mxu0 %v2201_v19  ;;  %2037 = vmatpush3.bf16.msra.mxu1 %v2202_v20 }
  0x34   : > { %2042 = vmatprep.subr.bf16.mxu0 %v2295_v1  ;;  %2050 = vmatprep.subr.bf16.mxu1 %v2295_v1 }
  0x36   : > { %2031 = vmatmul.mubr.msk.bf16.vlgmr.msra.gmra.mrb[12].mxu0 %vm424_vm1, %v394_v16  ;;  %2039 = vmatmul.mubr.msk.bf16.vlgmr.msra.gmra.mrb[12].mxu1 %vm424_vm1, %v394_v16 }
  0x37   : > { %2043 = vmatpush3.bf16.msra.mxu0 %v2203_v21  ;;  %2051 = vmatpush3.bf16.msra.mxu1 %v2204_v22 }
  0x38   : > { %2044 = vmatprep.subr.bf16.mxu0 %v2295_v1  ;;  %2052 = vmatprep.subr.bf16.mxu1 %v2295_v1 }
  0x39   : > { %2046 = vmatprep.mubr.msk.bf16.mxu0 %vm2296_vm0, %v2295_v1  ;;  %2054 = vmatprep.mubr.msk.bf16.mxu1 %vm2296_vm0, %v2295_v1 }
  0x3b   : > { %2045 = vmatpush3.bf16.msra.mxu0 %v2205_v23  ;;  %2053 = vmatpush3.bf16.msra.mxu1 %v2206_v24 }
  0x3c   : > { %2058 = vmatprep.subr.bf16.mxu0 %v2295_v1  ;;  %2066 = vmatprep.subr.bf16.mxu1 %v2295_v1 }
  0x3e   : > { %2047 = vmatmul.mubr.msk.bf16.vlgmr.msra.gmra.mrb[16].mxu0 %vm424_vm1, %v395_v26  ;;  %2055 = vmatmul.mubr.msk.bf16.vlgmr.msra.gmra.mrb[16].mxu1 %vm424_vm1, %v395_v26 }
  0x3f   : > { %2059 = vmatpush3.bf16.msra.mxu0 %v2207_v27  ;;  %2062 = vmatprep.mubr.msk.bf16.mxu0 %vm2296_vm0, %v2295_v1 }
  0x40   : > { %2060 = vmatprep.subr.bf16.mxu0 %v2295_v1  ;;  %2067 = vmatpush3.bf16.msra.mxu1 %v2208_v28 }
  0x41   : > { %2070 = vmatprep.mubr.msk.bf16.mxu1 %vm2296_vm0, %v2295_v1  ;;  %2068 = vmatprep.subr.bf16.mxu1 %v2295_v1 }
  0x43   : > { %2061 = vmatpush3.bf16.msra.mxu0 %v2209_v29 }
  0x44   : > { %2069 = vmatpush3.bf16.msra.mxu1 %v2210_v30  ;;  %2074 = vmatprep.subr.bf16.mxu0 %v2295_v1 }
  0x45   : > { %2080 = vmatprep.subr.bf16.mxu1 %v2295_v1 }
  0x46   : > { %2063 = vmatmul.mubr.msk.bf16.vlgmr.msra.gmra.mrb[20].mxu0 %vm424_vm1, %v395_v26 }
  0x47   : > { %2071 = vmatmul.mubr.msk.bf16.vlgmr.msra.gmra.mrb[20].mxu1 %vm424_vm1, %v395_v26  ;;  %2076 = vmatprep.mubr.msk.bf16.mxu0 %vm2296_vm0, %v2295_v1 }
  0x48   : > { %2082 = vmatprep.mubr.msk.bf16.mxu1 %vm2296_vm0, %v2295_v1 }
  0xf1   : > { %v462_v31 = vpop.f32.mrb[0].mxu0  ;;  %v514_v32 = vpop.f32.mrb[0].mxu1 }
  0xf2   : > { %v1984_v33 = vpop.f32.mrb[1].mxu0  ;;  %v1992_v34 = vpop.f32.mrb[1].mxu1  ;;  %v1078_v59 = vmul.f32 0.35355338, %v462_v31  ;;  %v1079_v60 = vmul.f32 0.35355338, %v514_v32 }
  0xf3   : > { %v465_v35 = vpop.f32.mrb[2].mxu0  ;;  %v517_v36 = vpop.f32.mrb[2].mxu1 }
  0xf4   : > { %v1985_v37 = vpop.f32.mrb[3].mxu0  ;;  %v1993_v38 = vpop.f32.mrb[3].mxu1  ;;  %v1082_v63 = vpack.c.bf16 %v1078_v59, %v1078_v59  ;;  %v1083_v0 = vpack.c.bf16 %v1079_v60, %v1079_v60 }
  0xf9   : > { %v566_v39 = vpop.f32.mrb[4].mxu0  ;;  %v618_v40 = vpop.f32.mrb[4].mxu1 }
  0xfa   : > { %v2000_v41 = vpop.f32.mrb[5].mxu0  ;;  %v2008_v42 = vpop.f32.mrb[5].mxu1  ;;  %v1080_v13 = vmul.f32 0.35355338, %v566_v39  ;;  %v1081_v14 = vmul.f32 0.35355338, %v618_v40 }
  0xfb   : > { %v569_v43 = vpop.f32.mrb[6].mxu0  ;;  %v621_v44 = vpop.f32.mrb[6].mxu1 }
  0xfc   : > { %v2001_v45 = vpop.f32.mrb[7].mxu0  ;;  %v2009_v46 = vpop.f32.mrb[7].mxu1  ;;  %v1084_v15 = vpack.c.bf16 %v1080_v13, %v1080_v13  ;;  %v1085_v16 = vpack.c.bf16 %v1081_v14, %v1081_v14 }
 0x101   : > { %v689_v47 = vpop.f32.mrb[8].mxu0  ;;  %v741_v48 = vpop.f32.mrb[8].mxu1 }
 0x102   : > { %v1086_v49 = vpack.c.bf16 %v689_v47, %v689_v47  ;;  %v1087_v50 = vpack.c.bf16 %v741_v48, %v741_v48  ;;  %v2016_v51 = vpop.f32.mrb[9].mxu0  ;;  %v2024_v52 = vpop.f32.mrb[9].mxu1 }
 0x103   : > { %v692_v53 = vpop.f32.mrb[10].mxu0  ;;  %v744_v54 = vpop.f32.mrb[10].mxu1 }
 0x104   : > { %v1099_v55 = vsel %vm1094_vm2, %v1086_v49, 0  ;;  %v1145_v56 = vsel %vm1094_vm2, %v1087_v50, 0  ;;  %v2017_v57 = vpop.f32.mrb[11].mxu0  ;;  %v2025_v58 = vpop.f32.mrb[11].mxu1 }
 0x105   : > { %2075 = vmatpush3.bf16.xpose.msra.mxu0 %v1099_v55  ;;  %2081 = vmatpush3.bf16.xpose.msra.mxu1 %v1145_v56 }
 0x106   : > { %2086 = vmatprep.subr.bf16.mxu0 %v2295_v1  ;;  %2092 = vmatprep.subr.bf16.mxu1 %v2295_v1 }
 0x109   : > { %v793_v61 = vpop.f32.mrb[12].mxu0  ;;  %v845_v62 = vpop.f32.mrb[12].mxu1 }
 0x10a   : > { %v1088_v2 = vpack.c.bf16 %v793_v61, %v793_v61  ;;  %v1089_v3 = vpack.c.bf16 %v845_v62, %v845_v62  ;;  %v2032_v4 = vpop.f32.mrb[13].mxu0  ;;  %v2040_v5 = vpop.f32.mrb[13].mxu1 }
 0x10b   : > { %v796_v6 = vpop.f32.mrb[14].mxu0  ;;  %v848_v8 = vpop.f32.mrb[14].mxu1 }
 0x10c   : > { %v1191_v9 = vsel %vm1094_vm2, %v1088_v2, 0  ;;  %v1237_v10 = vsel %vm1094_vm2, %v1089_v3, 0  ;;  %v2033_v11 = vpop.f32.mrb[15].mxu0  ;;  %2077 = vmatmul.mubr.msk.bf16.vlgmr.msra.gmra.mrb[24].mxu0 %vm1094_vm2, %v1082_v63  ;;  %2083 = vmatmul.mubr.msk.bf16.vlgmr.msra.gmra.mrb[24].mxu1 %vm1094_vm2, %v1083_v0  ;;  %v2041_v12 = vpop.f32.mrb[15].mxu1 }
 0x10d   : > { %2087 = vmatpush3.bf16.xpose.msra.mxu0 %v1191_v9  ;;  %2093 = vmatpush3.bf16.xpose.msra.mxu1 %v1237_v10 }
 0x10e   : > { %2088 = vmatprep.mubr.msk.bf16.mxu0 %vm2296_vm0, %v2295_v1  ;;  %2094 = vmatprep.mubr.msk.bf16.mxu1 %vm2296_vm0, %v2295_v1 }
 0x10f   : > { %2098 = vmatprep.subr.bf16.mxu0 %v2295_v1  ;;  %2104 = vmatprep.subr.bf16.mxu1 %v2295_v1 }
 0x111   : > { %v916_v17 = vpop.f32.mrb[16].mxu0  ;;  %v968_v21 = vpop.f32.mrb[16].mxu1 }
 0x112   : > { %v1090_v18 = vpack.c.bf16 %v916_v17, %v916_v17  ;;  %v2048_v19 = vpop.f32.mrb[17].mxu0  ;;  %v1091_v24 = vpack.c.bf16 %v968_v21, %v968_v21  ;;  %v2056_v25 = vpop.f32.mrb[17].mxu1 }
 0x113   : > { %v919_v20 = vpop.f32.mrb[18].mxu0  ;;  %v971_v26 = vpop.f32.mrb[18].mxu1 }
 0x114   : > { %2089 = vmatmul.mubr.msk.bf16.vlgmr.msra.gmra.mrb[28].mxu0 %vm1094_vm2, %v1084_v15  ;;  %2095 = vmatmul.mubr.msk.bf16.vlgmr.msra.gmra.mrb[28].mxu1 %vm1094_vm2, %v1085_v16  ;;  %v1332_v22 = vsel %vm1330_vm3, %v1090_v18, 0  ;;  %v2049_v23 = vpop.f32.mrb[19].mxu0  ;;  %v1378_v27 = vsel %vm1330_vm3, %v1091_v24, 0  ;;  %v2057_v28 = vpop.f32.mrb[19].mxu1 }
 0x115   : > { %2100 = vmatprep.mubr.msk.bf16.mxu0 %vm2296_vm0, %v2295_v1  ;;  %2106 = vmatprep.mubr.msk.bf16.mxu1 %vm2296_vm0, %v2295_v1 }
 0x116   : > { %2099 = vmatpush3.bf16.msra.mxu0 %v1332_v22  ;;  %2105 = vmatpush3.bf16.msra.mxu1 %v1378_v27 }
 0x117   : > { %2110 = vmatprep.subr.bf16.mxu0 %v2295_v1  ;;  %2116 = vmatprep.subr.bf16.mxu1 %v2295_v1 }
 0x119   : > { %v2583_v29 = vpop.f32.mrb[20].mxu0 }
 0x11a   : > { %v2585_v30 = vpop.f32.mrb[20].mxu1  ;;  %v2064_v31 = vpop.f32.mrb[21].mxu0  ;;  %v1092_v19 = vpack.c.bf16 %v2583_v29, %v2583_v29  ;;  %v1516_v29 = vld [vmem:[%s2711_s6] sm:$0xf] }
 0x11b   : > { %v2072_v32 = vpop.f32.mrb[21].mxu1  ;;  %v1023_v33 = vpop.f32.mrb[22].mxu0  ;;  %v1093_v25 = vpack.c.bf16 %v2585_v30, %v2585_v30 }
 0x11c   : > { %v1075_v34 = vpop.f32.mrb[22].mxu1  ;;  %v2065_v35 = vpop.f32.mrb[23].mxu0  ;;  %v1424_v24 = vsel %vm1330_vm3, %v1092_v19, 0  ;;  %v1524_v33 = vsel %vm1330_vm3, %v1516_v29, 0 }
 0x11d   : > { %v2073_v36 = vpop.f32.mrb[23].mxu1  ;;  %v1470_v31 = vsel %vm1330_vm3, %v1093_v25, 0 }
 0x1df   : > { %v1135_v37 = vpop.f32.mrb[24].mxu0  ;;  %v1181_v38 = vpop.f32.mrb[24].mxu1 }
 0x1e0   : > { %v2078_v39 = vpop.f32.mrb[25].mxu0  ;;  %v2084_v40 = vpop.f32.mrb[25].mxu1  ;;  %v1279_v41 = vsel %vm1094_vm2, %v1135_v37, -inf  ;;  %v1282_v46 = vsel %vm1094_vm2, %v1181_v38, -inf }
 0x1e1   : > { %v1184_v42 = vpop.f32.mrb[26].mxu1  ;;  %1280 = vmax.xlane.f32.xlu0 %v1279_v41  ;;  %v1138_v43 = vpop.f32.mrb[26].mxu0  ;;  %v1518_v39 = vld [vmem:[%s2711_s6 + $0x8] sm:$0xf] }
 0x1e2   : > { %v2079_v44 = vpop.f32.mrb[27].mxu0  ;;  %v2085_v45 = vpop.f32.mrb[27].mxu1  ;;  %v1616_v43 = vsel %vm1330_vm3, %v1518_v39, 0 }
 0x1e3   : > { %v1519_v45 = vld [vmem:[%s2711_s6 + $0xc] sm:$0xf] }
 0x1e5   : > { %1283 = vmax.xlane.f32.xlu0 %v1282_v46 }
 0x1e7   : > { %v1227_v47 = vpop.f32.mrb[28].mxu0  ;;  %v1273_v48 = vpop.f32.mrb[28].mxu1 }
 0x1e8   : > { %v2090_v49 = vpop.f32.mrb[29].mxu0  ;;  %v2096_v50 = vpop.f32.mrb[29].mxu1  ;;  %v1285_v51 = vsel %vm1094_vm2, %v1227_v47, -inf  ;;  %v1288_v56 = vsel %vm1094_vm2, %v1273_v48, -inf }
 0x1e9   : > { %v1276_v52 = vpop.f32.mrb[30].mxu1  ;;  %1286 = vmax.xlane.f32.xlu1 %v1285_v51  ;;  %v1230_v53 = vpop.f32.mrb[30].mxu0  ;;  %v1662_v50 = vsel %vm1330_vm3, %v1519_v45, 0 }
 0x1ea   : > { %v2091_v54 = vpop.f32.mrb[31].mxu0  ;;  %v2097_v55 = vpop.f32.mrb[31].mxu1 }
 0x1ed   : > { %1289 = vmax.xlane.f32.xlu1 %v1288_v56 }
 0x26e   : > { %v1281_v57 = vpop.xlane.xlu0 %1280 }
 0x26f   : > { %v1291_v58 = vsub.f32 %v1135_v37, %v1281_v57  ;;  %v1517_v37 = vld [vmem:[%s2711_s6 + $0x4] sm:$0xf] }
 0x271   : > { %v1295_v59 = vmul.f32 1.442695, %v1291_v58 }
 0x272   : > { %v1284_v60 = vpop.xlane.xlu0 %1283 }
 0x273   : > { %2211 = vpow2.f32 %v1295_v59  ;;  %v1292_v61 = vsub.f32 %v1181_v38, %v1284_v60  ;;  %v1570_v38 = vsel %vm1330_vm3, %v1517_v37, 0 }
 0x275   : > { %v1297_v62 = vmul.f32 1.442695, %v1292_v61 }
 0x276   : > { %v1287_v63 = vpop.xlane.xlu1 %1286 }
 0x277   : > { %2213 = vpow2.f32 %v1297_v62  ;;  %v1293_v0 = vsub.f32 %v1227_v47, %v1287_v63 }
 0x279   : > { %v1299_v2 = vmul.f32 1.442695, %v1293_v0 }
 0x27a   : > { %v1290_v3 = vpop.xlane.xlu1 %1289 }
 0x27b   : > { %2215 = vpow2.f32 %v1299_v2  ;;  %v1294_v4 = vsub.f32 %v1273_v48, %v1290_v3 }
 0x27d   : > { %v2212_v5 = vpop.eup %2211  ;;  %v1301_v6 = vmul.f32 1.442695, %v1294_v4 }
 0x27e   : > { %v1303_v8 = vsel %vm1094_vm2, %v2212_v5, 0.0 }
 0x27f   : > { %2217 = vpow2.f32 %v1301_v6  ;;  %1304 = vadd.xlane.f32.xlu0 %v1303_v8 }
 0x281   : > { %v2214_v9 = vpop.eup %2213 }
 0x282   : > { %v1306_v10 = vsel %vm1094_vm2, %v2214_v9, 0.0 }
 0x283   : > { %1307 = vadd.xlane.f32.xlu1 %v1306_v10 }
 0x285   : > { %v2216_v11 = vpop.eup %2215 }
 0x286   : > { %v1309_v12 = vsel %vm1094_vm2, %v2216_v11, 0.0 }
 0x287   : > { %1310 = vadd.xlane.f32.xlu0 %v1309_v12 }
 0x289   : > { %v2218_v13 = vpop.eup %2217 }
 0x28a   : > { %v1312_v14 = vsel %vm1094_vm2, %v2218_v13, 0.0 }
 0x28b   : > { %1313 = vadd.xlane.f32.xlu1 %v1312_v14 }
 0x30c   : > { %v1305_v15 = vpop.xlane.xlu0 %1304 }
 0x30d   : > { %2219 = vrcp.f32 %v1305_v15 }
 0x310   : > { %v1308_v16 = vpop.xlane.xlu1 %1307 }
 0x311   : > { %2221 = vrcp.f32 %v1308_v16 }
 0x314   : > { %v1311_v17 = vpop.xlane.xlu0 %1310 }
 0x315   : > { %2223 = vrcp.f32 %v1311_v17 }
 0x317   : > { %v2220_v18 = vpop.eup %2219 }
 0x318   : > { %v1319_v20 = vmul.f32 %v2220_v18, %v2212_v5  ;;  %v1314_v21 = vpop.xlane.xlu1 %1313 }
 0x319   : > { %2225 = vrcp.f32 %v1314_v21 }
 0x31a   : > { %v1323_v22 = vpack.c.bf16 %v1319_v20, %v1319_v20 }
 0x31b   : > { %v2222_v23 = vpop.eup %2221 }
 0x31c   : > { %v1320_v26 = vmul.f32 %v2222_v23, %v2214_v9  ;;  %2101 = vmatmul.mubr.msk.bf16.vlgmr.msra.gmra.mrb[32].mxu0 %vm1094_vm2, %v1323_v22  ;;  %v1911_v23 = vld [vmem:[%s2712_s7] ss:$0 sm:$0xff] }
 0x31d   : > { %2111 = vmatpush3.bf16.msra.mxu0 %v1424_v24  ;;  %2112 = vmatprep.mubr.msk.bf16.mxu0 %vm2296_vm0, %v2295_v1 }
 0x31e   : > { %v1324_v27 = vpack.c.bf16 %v1320_v26, %v1320_v26  ;;  %2122 = vmatprep.subr.bf16.mxu0 %v2295_v1 }
 0x31f   : > { %v2224_v28 = vpop.eup %2223 }
 0x320   : > { %v1321_v32 = vmul.f32 %v2224_v28, %v2216_v11  ;;  %2107 = vmatmul.mubr.msk.bf16.vlgmr.msra.gmra.mrb[32].mxu1 %vm1094_vm2, %v1324_v27 }
 0x321   : > { %2117 = vmatpush3.bf16.msra.mxu1 %v1470_v31  ;;  %2118 = vmatprep.mubr.msk.bf16.mxu1 %vm2296_vm0, %v2295_v1 }
 0x322   : > { %v1325_v30 = vpack.c.bf16 %v1321_v32, %v1321_v32  ;;  %2128 = vmatprep.subr.bf16.mxu1 %v2295_v1 }
 0x323   : > { %v2226_v34 = vpop.eup %2225 }
 0x324   : > { %v1322_v35 = vmul.f32 %v2226_v34, %v2218_v13  ;;  %2113 = vmatmul.mubr.msk.bf16.vlgmr.msra.gmra.mrb[36].mxu0 %vm1094_vm2, %v1325_v30 }
 0x325   : > { %2123 = vmatpush3.bf16.msra.mxu0 %v1524_v33  ;;  %2124 = vmatprep.mubr.msk.bf16.mxu0 %vm2296_vm0, %v2295_v1 }
 0x326   : > { %v1326_v36 = vpack.c.bf16 %v1322_v35, %v1322_v35  ;;  %2134 = vmatprep.subr.bf16.mxu0 %v2295_v1 }
 0x328   : > { %2119 = vmatmul.mubr.msk.bf16.vlgmr.msra.gmra.mrb[36].mxu1 %vm1094_vm2, %v1326_v36 }
 0x329   : > { %2130 = vmatprep.mubr.msk.bf16.mxu1 %vm2296_vm0, %v2295_v1  ;;  %2129 = vmatpush3.bf16.msra.mxu1 %v1570_v38 }
 0x32a   : > { %2140 = vmatprep.subr.bf16.mxu1 %v2295_v1 }
 0x3ef   : > { %v1368_v40 = vpop.f32.mrb[32].mxu0 }
 0x3f0   : > { %v1512_v41 = vpack.c.bf16 %v1368_v40, %v1368_v40  ;;  %v2102_v42 = vpop.f32.mrb[33].mxu0  ;;  %v1912_v40 = vld [vmem:[%s2713_s8] ss:$0 sm:$0xff] }
 0x3f1   : > { %v1371_v44 = vpop.f32.mrb[34].mxu0  ;;  %v1913_v42 = vld [vmem:[%s2714_s9] ss:$0 sm:$0xff] }
 0x3f2   : > { %v2103_v46 = vpop.f32.mrb[35].mxu0  ;;  %2125 = vmatmul.mubr.msk.bf16.vlgmr.msra.gmra.mrb[40].mxu0 %vm1094_vm2, %v1512_v41 }
 0x3f3   : > { %v1414_v47 = vpop.f32.mrb[32].mxu1  ;;  %2135 = vmatpush3.bf16.msra.mxu0 %v1616_v43  ;;  %2136 = vmatprep.mubr.msk.bf16.mxu0 %vm2296_vm0, %v2295_v1 }
 0x3f4   : > { %v1513_v48 = vpack.c.bf16 %v1414_v47, %v1414_v47  ;;  %v2108_v49 = vpop.f32.mrb[33].mxu1 }
 0x3f5   : > { %v1417_v51 = vpop.f32.mrb[34].mxu1 }
 0x3f6   : > { %v2109_v52 = vpop.f32.mrb[35].mxu1  ;;  %2131 = vmatmul.mubr.msk.bf16.vlgmr.msra.gmra.mrb[40].mxu1 %vm1094_vm2, %v1513_v48 }
 0x3f7   : > { %v1460_v53 = vpop.f32.mrb[36].mxu0  ;;  %2141 = vmatpush3.bf16.msra.mxu1 %v1662_v50  ;;  %2142 = vmatprep.mubr.msk.bf16.mxu1 %vm2296_vm0, %v2295_v1 }
 0x3f8   : > { %v1514_v54 = vpack.c.bf16 %v1460_v53, %v1460_v53  ;;  %v2114_v55 = vpop.f32.mrb[37].mxu0 }
 0x3f9   : > { %v1463_v56 = vpop.f32.mrb[38].mxu0 }
 0x3fa   : > { %v2115_v57 = vpop.f32.mrb[39].mxu0  ;;  %2137 = vmatmul.mubr.msk.bf16.vlgmr.msra.gmra.mrb[44].mxu0 %vm1094_vm2, %v1514_v54 }
 0x3fb   : > { %v1506_v58 = vpop.f32.mrb[36].mxu1 }
 0x3fc   : > { %v1515_v59 = vpack.c.bf16 %v1506_v58, %v1506_v58  ;;  %v2120_v60 = vpop.f32.mrb[37].mxu1 }
 0x3fd   : > { %v1509_v61 = vpop.f32.mrb[38].mxu1 }
 0x3fe   : > { %v2121_v62 = vpop.f32.mrb[39].mxu1  ;;  %2143 = vmatmul.mubr.msk.bf16.vlgmr.msra.gmra.mrb[44].mxu1 %vm1094_vm2, %v1515_v59 }
 0x4c5   : > { %v1560_v63 = vpop.f32.mrb[40].mxu0 }
 0x4c6   : > { %v2126_v0 = vpop.f32.mrb[41].mxu0  ;;  %v1704_v1 = vsel %vm424_vm1, %v1560_v63, 0.0 }
 0x4c7   : > { %v1563_v2 = vpop.f32.mrb[42].mxu0 }
 0x4c8   : > { %v2127_v3 = vpop.f32.mrb[43].mxu0 }
 0x4c9   : > { %v1606_v4 = vpop.f32.mrb[40].mxu1 }
 0x4ca   : > { %v1705_v5 = vsel %vm424_vm1, %v1606_v4, 0.0  ;;  %v2132_v6 = vpop.f32.mrb[41].mxu1 }
 0x4cb   : > { %v1706_v8 = vadd.f32 %v1705_v5, %v1704_v1  ;;  %v1609_v9 = vpop.f32.mrb[42].mxu1 }
 0x4cc   : > { %v2133_v10 = vpop.f32.mrb[43].mxu1 }
 0x4cd   : > { %v1652_v11 = vpop.f32.mrb[44].mxu0 }
 0x4ce   : > { %v1707_v12 = vsel %vm424_vm1, %v1652_v11, 0.0  ;;  %v2138_v13 = vpop.f32.mrb[45].mxu0 }
 0x4cf   : > { %v1708_v14 = vadd.f32 %v1707_v12, %v1706_v8  ;;  %v1655_v15 = vpop.f32.mrb[46].mxu0 }
 0x4d0   : > { %v2139_v16 = vpop.f32.mrb[47].mxu0 }
 0x4d1   : > { %v1698_v17 = vpop.f32.mrb[44].mxu1 }
 0x4d2   : > { %v1709_v18 = vsel %vm424_vm1, %v1698_v17, 0.0  ;;  %v2144_v19 = vpop.f32.mrb[45].mxu1 }
 0x4d3   : > { %v1710_v20 = vadd.f32 %v1709_v18, %v1708_v14  ;;  %v1701_v21 = vpop.f32.mrb[46].mxu1 }
 0x4d4   : > { %v2145_v22 = vpop.f32.mrb[47].mxu1 }
 0x4d5   : > { %v1711_v24 = vadd.f32 %v1710_v20, %v2436_v7 }
 0x4d7   : > { %v1719_v25 = vadd.f32 %v1911_v23, %v1711_v24 }
 0x4d9   : > { %v1720_v26 = vsel %vm424_vm1, %v1719_v25, 0.0 }
 0x4da   : > { %1721 = vadd.xlane.f32.xlu0 %v1720_v26 }
 0x567   : > { %v1722_v27 = vpop.xlane.xlu0 %1721 }
 0x568   : > { %v1724_v28 = vmul.f32 0.03125, %v1722_v27 }
 0x56a   : > { %v1725_v29 = vsub.f32 %v1719_v25, %v1724_v28 }
 0x56c   : > { %v1726_v31 = vmul.f32 %v1725_v29, %v1725_v29 }
 0x56e   : > { %v1727_v32 = vsel %vm424_vm1, %v1726_v31, 0.0 }
 0x56f   : > { %1728 = vadd.xlane.f32.xlu1 %v1727_v32 }
 0x5fc   : > { %v1729_v30 = vpop.xlane.xlu1 %1728 }
 0x5fd   : > { %v1730_v33 = vmul.f32 0.032258064, %v1729_v30 }
 0x5ff   : > { %2227 = vrsqrt.f32 %v1730_v33  ;;  %vm1733_vm4 = vcmp.eq.f32.partialorder %v1730_v33, inf  ;;  %v1736_v7 = vand.u32 2147483648, %v1730_v33  ;;  %vm1735_vm5 = vcmp.eq.f32.partialorder %v1730_v33, 0.0 }
 0x609   : > { %v2228_v34 = vpop.eup %2227 }
 0x60a   : > { %v1732_v35 = vmul.f32 %v2228_v34, %v1730_v33 }
 0x60c   : > { %v1734_v36 = vsel %vm1733_vm4, %v1730_v33, %v1732_v35 }
 0x60d   : > { %v1737_v37 = vsel %vm1735_vm5, %v1736_v7, %v1734_v36 }
 0x60e   : > { %v1738_v38 = vadd.f32 0.001, %v1737_v37 }
 0x610   : > { %2229 = vrcp.f32 %v1738_v38 }
 0x61a   : > { %v2230_v39 = vpop.eup %2229 }
 0x61b   : > { %v1741_v41 = vmul.f32 %v2230_v39, %v1725_v29 }
 0x61d   : > { %v1748_v43 = vmul.f32 %v1912_v40, %v1741_v41 }
 0x61f   : > { %v1756_v44 = vadd.f32 %v1913_v42, %v1748_v43 }
 0x621   : > { %1757 = vst.msk [vmem:[%s376_s28] sm:$0xff] %vm424_vm1, %v1756_v44 }
 0x622   : > { %2244 = shalt.err (!%p2241_p3)
}
 0x623   : > { %s2245_s11 = scalar_lea.hbm %s2662_s0, 128  ;;  %s2249_s28 = scalar_lea.hbm %s2715_s10, 256 }
 0x624   : > { %p2246_p4 = scmp.ne.s32.totalorder %s2662_s0, %s2245_s11  ;;  %p2250_p9 = scmp.lt.u32.totalorder %s2662_s0, %s2715_s10 }
 0x625   : > { %p2251_p10 = scmp.lt.u32.totalorder %s2249_s28, %s2245_s11  ;;  %p2253_p12 = scmp.lt.u32.totalorder %s2245_s11, %s2662_s0 }
 0x626   : > { %p2247_p7 = pnand %p2246_p4, %p2391_p5 }
 0x627   : > { %p2252_p11 = por %p2251_p10, %p2250_p9 }
 0x628   : > { %p2248_p8 = pneg %p2247_p7 }
 0x629   : > { %p2254_p13 = por %p2253_p12, %p2252_p11 }
 0x62b   : > { %p2255_p0 = pnand %p2254_p13, %p2248_p8 }
 0x62d   : > { %2258 = shalt.err (!%p2255_p0)
}
 0x62e   : > { %2146 = dma.vmem_to_hbm [thread:$0]  (%p2391_p5), %s2664_s20, 128, %s2662_s0, %s1759_s18  }
 0x62f PF: > { %p2152_p1 = scmp.ge.s32.totalorder %s2293_s16, 2  ;;  %s1784_s21 = sand.u32 1, %s2281_s13  }
 0x630   : > { %s1785_s17 = scalar_lea.sflag [#allocation3], %s1784_s21 }
 0x631   : > { %p2149_p2 = pnand %p2152_p1, %p2395_p6 }
 0x633   : > { %2276 = dma.done.wait (!%p2149_p2), %s1785_s17, 128  }
 0x634   : > { %2278 = vsyncadd (!%p2149_p2), %s1785_s17, 4294967168  ;;  %p20_p3 = scmp.ge.s32.totalorder %s2378_s19, 4   ;;  %s2720_s13 = smov %s2285_s14 }
 0x635   : > { %s2721_s14 = smov %s2289_s15  ;;  %s2722_s15 = smov %s2389_s22 }
 0x636   : > { %s2723_s16 = smov %s2378_s19  ;;  %22 = sbr.rel (!%p20_p3) target bundleno = 5 (0x5), region = 101 }
 0x63d   :  { %1790 = vsyncpa [#allocation3], 1 }
 0x63e   :  { %1792 = vsyncpa [#allocation3 + $0x1], 1 }

</bundles_post_ra>
